<compile_context>
chip_gen: v6e
topology: v6e:2x2x1
jax: 0.10.0
libtpu: 0.0.40
codegen_flags: <defaults>
</compile_context>

<pallas_src>
import math
import functools

import jax
import jax.numpy as jnp
from jax import lax
from jax.experimental import pallas as pl
from jax.experimental.pallas import tpu as pltpu


def _and_all(conds):
    """AND a list of masks; None means 'no constraint'."""
    conds = [c for c in conds if c is not None]
    if not conds:
        return None
    m = conds[0]
    for c in conds[1:]:
        m = jnp.logical_and(m, c)
    return m


def _make_conv_kernel(H, W, KH, KW, Cin, Cout, pad, B):
    """Fused im2col + single-matmul conv kernel for B images per grid step.

    Refs:
      x_ref: (B, Cin, H*W)         flat images, H*W on the lane axis
      w_ref: (Cout, KH*KW*Cin)     im2col-ordered weights (tap-major, chan-minor)
      o_ref: (B, Cout, H*W)        lane-dense output (free reshape back to NCHW)
    """
    HW = H * W

    def conv_kernel(x_ref, w_ref, o_ref):
        # ---- Boundary masks: KH + KW comparisons total, computed once per
        # step and reused for every tap and every image (deduped). ----
        hw_idx = lax.broadcasted_iota(jnp.int32, (1, HW), 1)

        # Row masks need no divide:  h >= a  <=>  flat >= a*W ,
        #                            h <  c  <=>  flat <  c*W .
        h_masks = []
        for kh in range(KH):
            conds = []
            if kh < pad:                       # source row h + (kh-pad) < 0
                conds.append(hw_idx >= (pad - kh) * W)
            if kh > pad:                       # source row h + (kh-pad) >= H
                conds.append(hw_idx < (H - (kh - pad)) * W)
            h_masks.append(_and_all(conds))

        # Column masks: W is a power of two here, so % lowers to a lane AND.
        w_idx = hw_idx % W
        w_masks = []
        for kw in range(KW):
            conds = []
            if kw < pad:
                conds.append(w_idx >= (pad - kw))
            if kw > pad:
                conds.append(w_idx < W - (kw - pad))
            w_masks.append(_and_all(conds))

        tap_masks = [_and_all([h_masks[kh], w_masks[kw]])
                     for kh in range(KH) for kw in range(KW)]

        # ---- Build the (KH*KW*Cin, B*HW) im2col matrix in registers.
        # Each tap is an XLU lane roll of the flat image; the per-tap edge
        # mask implements the 'same' zero padding in-kernel (it also zeroes
        # anything that wrapped across a row / image boundary). ----
        cols = []
        for b in range(B):
            xb = x_ref[b]                                    # (Cin, HW)
            pieces = []
            for kh in range(KH):
                for kw in range(KW):
                    t = kh * KW + kw
                    s = (kh - pad) * W + (kw - pad)          # flat source offset
                    piece = xb if s == 0 else pltpu.roll(xb, (-s) % HW, axis=1)
                    m = tap_masks[t]
                    if m is not None:
                        piece = jnp.where(m, piece, 0.0)
                    pieces.append(piece)
            cols.append(jnp.concatenate(pieces, axis=0))     # (KH*KW*Cin, HW)
        col = cols[0] if B == 1 else jnp.concatenate(cols, axis=1)

        # One fused MXU matmul over all B images (f32 accumulation).
        # normalization = Identity, activation = Identity.
        acc = jnp.dot(w_ref[...], col, preferred_element_type=jnp.float32)

        # Lane-dense, unmasked (Cout, HW) stores at 128-aligned lane offsets.
        for b in range(B):
            o_ref[b] = acc[:, b * HW:(b + 1) * HW].astype(o_ref.dtype)

    return conv_kernel


def _grid_steps_for(n_images):
    """Pick the number of grid steps.

    v7x has 2 TensorCores per chip: keep 2 parallel steps when the batch
    splits evenly so both TCs get work.  v5e/v6e have 1 TC (the grid is a
    sequential loop), so folding the whole batch into a single step removes
    the ~600-cycle fixed cost of the extra step and merges the input DMAs.
    """
    try:
        kind = jax.devices()[0].device_kind.lower()
    except Exception:
        kind = ""
    if "v7" in kind and n_images >= 2 and n_images % 2 == 0:
        return 2
    return 1


def prepare_conv_weight(weight_oihw):
    """One-time (init-time) reorder of the conv weight to im2col layout:
    (Cout, Cin, KH, KW) -> (Cout, KH*KW*Cin), tap-major / channel-minor."""
    Cout, Cin, KH, KW = weight_oihw.shape
    return jnp.transpose(weight_oihw, (0, 2, 3, 1)).reshape(Cout, KH * KW * Cin)


@functools.partial(jax.jit, static_argnames=("kernel_size", "grid_steps"))
def conv_forward(x_nchw, w_im2col, *, kernel_size, grid_steps):
    """Forward of `Conv` (defaults): y = Identity(Identity(conv2d(x)))."""
    N, Cin, H, W = x_nchw.shape
    Cout, KKC = w_im2col.shape
    KH = KW = kernel_size
    # Only the module-default config is supported (fail loudly otherwise).
    assert KKC == KH * KW * Cin, "weight does not match kernel_size/in_channels"
    assert KH % 2 == 1, "'same' padding path requires odd kernel_size"
    assert N % grid_steps == 0, "grid_steps must divide the batch"
    pad = (KH - 1) // 2                   # module default: 'same' padding
    HW = H * W
    B = N // grid_steps                   # images per grid step

    # VMEM / vreg footprint guard (re-derive before scaling H*W — the design
    # holds a whole image on lanes and a KH*KW*Cin-row im2col in registers).
    # At the module defaults this is ~0.15 MB/step; keep far under the scoped
    # VMEM limit (32 MiB default on v6e/v7x, 16 MiB on v5e; v7x physical VMEM
    # is only 64 MiB).
    step_bytes = 4 * B * HW * (2 * Cin + 2 * Cout + KH * KW * Cin + Cout)
    assert step_bytes < 8 * 1024 * 1024, (
        "Per-step footprint too large for the whole-image-on-lanes conv; "
        "add spatial tiling with halos or reduce images per step.")

    # Free reshape only (contiguous minor dims merge) -- no transpose, no pad.
    x_flat = x_nchw.reshape(N, Cin, HW)

    kernel = _make_conv_kernel(H, W, KH, KW, Cin, Cout, pad, B)

    out_flat = pl.pallas_call(
        kernel,
        out_shape=jax.ShapeDtypeStruct((N, Cout, HW), x_nchw.dtype),
        grid_spec=pltpu.PrefetchScalarGridSpec(
            num_scalar_prefetch=0,
            grid=(grid_steps,),                        # B images per step
            in_specs=[
                pl.BlockSpec((B, Cin, HW), lambda g: (g, 0, 0)),
                # Constant index_map: the ~1 KB weight block is not re-copied
                # between consecutive grid steps by the Pallas pipeline.
                pl.BlockSpec((Cout, KKC), lambda g: (0, 0)),
            ],
            out_specs=pl.BlockSpec((B, Cout, HW), lambda g: (g, 0, 0)),
        ),
        compiler_params=pltpu.CompilerParams(
            dimension_semantics=("parallel",)),        # megacore / v7x 2-TC
    )(x_flat, w_im2col)

    # Free reshape back to NCHW -- no final transpose pass over HBM.
    return out_flat.reshape(N, Cout, H, W)


def init_conv_weight(key, in_channels, out_channels, kernel_size):
    """Deterministic xavier_uniform_ with gain = calculate_gain('leaky_relu')."""
    gain = math.sqrt(2.0 / (1.0 + 0.01 ** 2))   # leaky_relu gain, slope=0.01
    fan_in = in_channels * kernel_size * kernel_size
    fan_out = out_channels * kernel_size * kernel_size
    bound = gain * math.sqrt(6.0 / (fan_in + fan_out))
    return jax.random.uniform(
        key, (out_channels, in_channels, kernel_size, kernel_size),
        minval=-bound, maxval=bound, dtype=jnp.float32)


if __name__ == "__main__":
    key = jax.random.PRNGKey(0)
    kx, kw_key = jax.random.split(key)

    N, Cin, H, W = 2, 4, 16, 16
    Cout, K = 8, 3
    pad = (K - 1) // 2

    x = jax.random.normal(kx, (N, Cin, H, W), dtype=jnp.float32)
    weight = init_conv_weight(kw_key, Cin, Cout, K)
    # Hoisted out of the forward path: im2col weight layout computed once.
    w2 = prepare_conv_weight(weight)

    grid_steps = _grid_steps_for(N)
    y = conv_forward(x, w2, kernel_size=K, grid_steps=grid_steps)
    y = jax.block_until_ready(y)

    # Reference: XLA conv with the same semantics as nn.Conv2d (bias=False).
    y_ref = lax.conv_general_dilated(
        x, weight, window_strides=(1, 1),
        padding=((pad, pad), (pad, pad)),
        dimension_numbers=("NCHW", "OIHW", "NCHW"))
    assert y.shape == (N, Cout, H, W)
    assert jnp.allclose(y, y_ref, atol=1e-5, rtol=1e-5)

    print("KERNEL_OK")
</pallas_src>

<mosaic_0001>
module attributes {stable_mosaic.version = 11 : i64} {
  func.func @conv_kernel(%arg0: i32, %arg1: memref<2x4x256xf32, #tpu.memory_space<vmem>>, %arg2: memref<8x36xf32, #tpu.memory_space<vmem>>, %arg3: memref<2x8x256xf32, #tpu.memory_space<vmem>>) attributes {dimension_semantics = [#tpu.dimension_semantics<parallel>], iteration_bounds = array<i64: 1>, scalar_prefetch = 0 : i64, scratch_operands = 0 : i64, tpu.core_type = #tpu.core_type<tc>, window_params = [{transform_indices = @transform_0, window_bounds = array<i64: 2, 4, 256>}, {pipeline_mode = #tpu.pipeline_mode<synchronous>, transform_indices = @transform_1, window_bounds = array<i64: 8, 36>}, {transform_indices = @transform_2, window_bounds = array<i64: 2, 8, 256>}]} {
    %0 = tpu.iota {dimensions = array<i32: 1>} : vector<1x256xi32>
    %c16_i32 = arith.constant 16 : i32
    %1 = vector.broadcast %c16_i32 : i32 to vector<1x256xi32>
    %2 = arith.cmpi sge, %0, %1 : vector<1x256xi32>
    %c240_i32 = arith.constant 240 : i32
    %3 = vector.broadcast %c240_i32 : i32 to vector<1x256xi32>
    %4 = arith.cmpi slt, %0, %3 : vector<1x256xi32>
    %c16_i32_0 = arith.constant 16 : i32
    %c0_i32 = arith.constant 0 : i32
    %5 = arith.cmpi eq, %c16_i32_0, %c0_i32 : i32
    %c1_i32 = arith.constant 1 : i32
    %6 = arith.select %5, %c1_i32, %c16_i32_0 : i32
    %7 = vector.broadcast %6 : i32 to vector<1x256xi32>
    %8 = arith.remsi %0, %7 : vector<1x256xi32>
    %c0_i32_1 = arith.constant 0 : i32
    %9 = vector.broadcast %c0_i32_1 : i32 to vector<1x256xi32>
    %10 = arith.cmpi ne, %8, %9 : vector<1x256xi32>
    %c0_i32_2 = arith.constant 0 : i32
    %11 = vector.broadcast %c0_i32_2 : i32 to vector<1x256xi32>
    %12 = arith.cmpi slt, %8, %11 : vector<1x256xi32>
    %c0_i32_3 = arith.constant 0 : i32
    %13 = arith.cmpi slt, %6, %c0_i32_3 : i32
    %14 = vector.broadcast %13 : i1 to vector<1x256xi1>
    %15 = vector.broadcast %14 : vector<1x256xi1> to vector<1x256xi1>
    %16 = arith.xori %12, %15 : vector<1x256xi1>
    %17 = arith.andi %16, %10 : vector<1x256xi1>
    %18 = vector.broadcast %6 : i32 to vector<1x256xi32>
    %19 = arith.addi %8, %18 : vector<1x256xi32>
    %20 = arith.select %17, %19, %8 : vector<1x256xi1>, vector<1x256xi32>
    %c1_i32_4 = arith.constant 1 : i32
    %21 = vector.broadcast %c1_i32_4 : i32 to vector<1x256xi32>
    %22 = arith.cmpi sge, %20, %21 : vector<1x256xi32>
    %c15_i32 = arith.constant 15 : i32
    %23 = vector.broadcast %c15_i32 : i32 to vector<1x256xi32>
    %24 = arith.cmpi slt, %20, %23 : vector<1x256xi32>
    %25 = arith.andi %2, %22 : vector<1x256xi1>
    %26 = arith.andi %2, %24 : vector<1x256xi1>
    %27 = arith.andi %4, %22 : vector<1x256xi1>
    %28 = arith.andi %4, %24 : vector<1x256xi1>
    %c0 = arith.constant 0 : index
    %c0_5 = arith.constant 0 : index
    %c0_6 = arith.constant 0 : index
    %29 = vector.load %arg1[%c0, %c0_5, %c0_6] : memref<2x4x256xf32, #tpu.memory_space<vmem>>, vector<1x4x256xf32>
    %30 = vector.shape_cast %29 : vector<1x4x256xf32> to vector<4x256xf32>
    %c17_i32 = arith.constant 17 : i32
    %31 = tpu.dynamic_rotate %30 by %c17_i32 dim 1 : vector<4x256xf32>, i32 -> vector<4x256xf32>
    %cst = arith.constant 0.000000e+00 : f32
    %32 = vector.shape_cast %25 : vector<1x256xi1> to vector<1x256xi1>
    %33 = vector.broadcast %32 : vector<1x256xi1> to vector<4x256xi1>
    %34 = vector.broadcast %cst : f32 to vector<4x256xf32>
    %35 = arith.select %33, %31, %34 : vector<4x256xi1>, vector<4x256xf32>
    %c16_i32_7 = arith.constant 16 : i32
    %36 = tpu.dynamic_rotate %30 by %c16_i32_7 dim 1 : vector<4x256xf32>, i32 -> vector<4x256xf32>
    %cst_8 = arith.constant 0.000000e+00 : f32
    %37 = vector.shape_cast %2 : vector<1x256xi1> to vector<1x256xi1>
    %38 = vector.broadcast %37 : vector<1x256xi1> to vector<4x256xi1>
    %39 = vector.broadcast %cst_8 : f32 to vector<4x256xf32>
    %40 = arith.select %38, %36, %39 : vector<4x256xi1>, vector<4x256xf32>
    %c15_i32_9 = arith.constant 15 : i32
    %41 = tpu.dynamic_rotate %30 by %c15_i32_9 dim 1 : vector<4x256xf32>, i32 -> vector<4x256xf32>
    %cst_10 = arith.constant 0.000000e+00 : f32
    %42 = vector.shape_cast %26 : vector<1x256xi1> to vector<1x256xi1>
    %43 = vector.broadcast %42 : vector<1x256xi1> to vector<4x256xi1>
    %44 = vector.broadcast %cst_10 : f32 to vector<4x256xf32>
    %45 = arith.select %43, %41, %44 : vector<4x256xi1>, vector<4x256xf32>
    %c1_i32_11 = arith.constant 1 : i32
    %46 = tpu.dynamic_rotate %30 by %c1_i32_11 dim 1 : vector<4x256xf32>, i32 -> vector<4x256xf32>
    %cst_12 = arith.constant 0.000000e+00 : f32
    %47 = vector.shape_cast %22 : vector<1x256xi1> to vector<1x256xi1>
    %48 = vector.broadcast %47 : vector<1x256xi1> to vector<4x256xi1>
    %49 = vector.broadcast %cst_12 : f32 to vector<4x256xf32>
    %50 = arith.select %48, %46, %49 : vector<4x256xi1>, vector<4x256xf32>
    %c255_i32 = arith.constant 255 : i32
    %51 = tpu.dynamic_rotate %30 by %c255_i32 dim 1 : vector<4x256xf32>, i32 -> vector<4x256xf32>
    %cst_13 = arith.constant 0.000000e+00 : f32
    %52 = vector.shape_cast %24 : vector<1x256xi1> to vector<1x256xi1>
    %53 = vector.broadcast %52 : vector<1x256xi1> to vector<4x256xi1>
    %54 = vector.broadcast %cst_13 : f32 to vector<4x256xf32>
    %55 = arith.select %53, %51, %54 : vector<4x256xi1>, vector<4x256xf32>
    %c241_i32 = arith.constant 241 : i32
    %56 = tpu.dynamic_rotate %30 by %c241_i32 dim 1 : vector<4x256xf32>, i32 -> vector<4x256xf32>
    %cst_14 = arith.constant 0.000000e+00 : f32
    %57 = vector.shape_cast %27 : vector<1x256xi1> to vector<1x256xi1>
    %58 = vector.broadcast %57 : vector<1x256xi1> to vector<4x256xi1>
    %59 = vector.broadcast %cst_14 : f32 to vector<4x256xf32>
    %60 = arith.select %58, %56, %59 : vector<4x256xi1>, vector<4x256xf32>
    %c240_i32_15 = arith.constant 240 : i32
    %61 = tpu.dynamic_rotate %30 by %c240_i32_15 dim 1 : vector<4x256xf32>, i32 -> vector<4x256xf32>
    %cst_16 = arith.constant 0.000000e+00 : f32
    %62 = vector.shape_cast %4 : vector<1x256xi1> to vector<1x256xi1>
    %63 = vector.broadcast %62 : vector<1x256xi1> to vector<4x256xi1>
    %64 = vector.broadcast %cst_16 : f32 to vector<4x256xf32>
    %65 = arith.select %63, %61, %64 : vector<4x256xi1>, vector<4x256xf32>
    %c239_i32 = arith.constant 239 : i32
    %66 = tpu.dynamic_rotate %30 by %c239_i32 dim 1 : vector<4x256xf32>, i32 -> vector<4x256xf32>
    %cst_17 = arith.constant 0.000000e+00 : f32
    %67 = vector.shape_cast %28 : vector<1x256xi1> to vector<1x256xi1>
    %68 = vector.broadcast %67 : vector<1x256xi1> to vector<4x256xi1>
    %69 = vector.broadcast %cst_17 : f32 to vector<4x256xf32>
    %70 = arith.select %68, %66, %69 : vector<4x256xi1>, vector<4x256xf32>
    %71 = tpu.concatenate %35, %40, %45, %50, %30, %55, %60, %65, %70 in 0 : vector<4x256xf32>, vector<4x256xf32>, vector<4x256xf32>, vector<4x256xf32>, vector<4x256xf32>, vector<4x256xf32>, vector<4x256xf32>, vector<4x256xf32>, vector<4x256xf32> -> vector<36x256xf32>
    %c1 = arith.constant 1 : index
    %c0_18 = arith.constant 0 : index
    %c0_19 = arith.constant 0 : index
    %72 = vector.load %arg1[%c1, %c0_18, %c0_19] : memref<2x4x256xf32, #tpu.memory_space<vmem>>, vector<1x4x256xf32>
    %73 = vector.shape_cast %72 : vector<1x4x256xf32> to vector<4x256xf32>
    %c17_i32_20 = arith.constant 17 : i32
    %74 = tpu.dynamic_rotate %73 by %c17_i32_20 dim 1 : vector<4x256xf32>, i32 -> vector<4x256xf32>
    %cst_21 = arith.constant 0.000000e+00 : f32
    %75 = vector.shape_cast %25 : vector<1x256xi1> to vector<1x256xi1>
    %76 = vector.broadcast %75 : vector<1x256xi1> to vector<4x256xi1>
    %77 = vector.broadcast %cst_21 : f32 to vector<4x256xf32>
    %78 = arith.select %76, %74, %77 : vector<4x256xi1>, vector<4x256xf32>
    %c16_i32_22 = arith.constant 16 : i32
    %79 = tpu.dynamic_rotate %73 by %c16_i32_22 dim 1 : vector<4x256xf32>, i32 -> vector<4x256xf32>
    %cst_23 = arith.constant 0.000000e+00 : f32
    %80 = vector.shape_cast %2 : vector<1x256xi1> to vector<1x256xi1>
    %81 = vector.broadcast %80 : vector<1x256xi1> to vector<4x256xi1>
    %82 = vector.broadcast %cst_23 : f32 to vector<4x256xf32>
    %83 = arith.select %81, %79, %82 : vector<4x256xi1>, vector<4x256xf32>
    %c15_i32_24 = arith.constant 15 : i32
    %84 = tpu.dynamic_rotate %73 by %c15_i32_24 dim 1 : vector<4x256xf32>, i32 -> vector<4x256xf32>
    %cst_25 = arith.constant 0.000000e+00 : f32
    %85 = vector.shape_cast %26 : vector<1x256xi1> to vector<1x256xi1>
    %86 = vector.broadcast %85 : vector<1x256xi1> to vector<4x256xi1>
    %87 = vector.broadcast %cst_25 : f32 to vector<4x256xf32>
    %88 = arith.select %86, %84, %87 : vector<4x256xi1>, vector<4x256xf32>
    %c1_i32_26 = arith.constant 1 : i32
    %89 = tpu.dynamic_rotate %73 by %c1_i32_26 dim 1 : vector<4x256xf32>, i32 -> vector<4x256xf32>
    %cst_27 = arith.constant 0.000000e+00 : f32
    %90 = vector.shape_cast %22 : vector<1x256xi1> to vector<1x256xi1>
    %91 = vector.broadcast %90 : vector<1x256xi1> to vector<4x256xi1>
    %92 = vector.broadcast %cst_27 : f32 to vector<4x256xf32>
    %93 = arith.select %91, %89, %92 : vector<4x256xi1>, vector<4x256xf32>
    %c255_i32_28 = arith.constant 255 : i32
    %94 = tpu.dynamic_rotate %73 by %c255_i32_28 dim 1 : vector<4x256xf32>, i32 -> vector<4x256xf32>
    %cst_29 = arith.constant 0.000000e+00 : f32
    %95 = vector.shape_cast %24 : vector<1x256xi1> to vector<1x256xi1>
    %96 = vector.broadcast %95 : vector<1x256xi1> to vector<4x256xi1>
    %97 = vector.broadcast %cst_29 : f32 to vector<4x256xf32>
    %98 = arith.select %96, %94, %97 : vector<4x256xi1>, vector<4x256xf32>
    %c241_i32_30 = arith.constant 241 : i32
    %99 = tpu.dynamic_rotate %73 by %c241_i32_30 dim 1 : vector<4x256xf32>, i32 -> vector<4x256xf32>
    %cst_31 = arith.constant 0.000000e+00 : f32
    %100 = vector.shape_cast %27 : vector<1x256xi1> to vector<1x256xi1>
    %101 = vector.broadcast %100 : vector<1x256xi1> to vector<4x256xi1>
    %102 = vector.broadcast %cst_31 : f32 to vector<4x256xf32>
    %103 = arith.select %101, %99, %102 : vector<4x256xi1>, vector<4x256xf32>
    %c240_i32_32 = arith.constant 240 : i32
    %104 = tpu.dynamic_rotate %73 by %c240_i32_32 dim 1 : vector<4x256xf32>, i32 -> vector<4x256xf32>
    %cst_33 = arith.constant 0.000000e+00 : f32
    %105 = vector.shape_cast %4 : vector<1x256xi1> to vector<1x256xi1>
    %106 = vector.broadcast %105 : vector<1x256xi1> to vector<4x256xi1>
    %107 = vector.broadcast %cst_33 : f32 to vector<4x256xf32>
    %108 = arith.select %106, %104, %107 : vector<4x256xi1>, vector<4x256xf32>
    %c239_i32_34 = arith.constant 239 : i32
    %109 = tpu.dynamic_rotate %73 by %c239_i32_34 dim 1 : vector<4x256xf32>, i32 -> vector<4x256xf32>
    %cst_35 = arith.constant 0.000000e+00 : f32
    %110 = vector.shape_cast %28 : vector<1x256xi1> to vector<1x256xi1>
    %111 = vector.broadcast %110 : vector<1x256xi1> to vector<4x256xi1>
    %112 = vector.broadcast %cst_35 : f32 to vector<4x256xf32>
    %113 = arith.select %111, %109, %112 : vector<4x256xi1>, vector<4x256xf32>
    %114 = tpu.concatenate %78, %83, %88, %93, %73, %98, %103, %108, %113 in 0 : vector<4x256xf32>, vector<4x256xf32>, vector<4x256xf32>, vector<4x256xf32>, vector<4x256xf32>, vector<4x256xf32>, vector<4x256xf32>, vector<4x256xf32>, vector<4x256xf32> -> vector<36x256xf32>
    %115 = tpu.concatenate %71, %114 in 1 : vector<36x256xf32>, vector<36x256xf32> -> vector<36x512xf32>
    %c0_36 = arith.constant 0 : index
    %c0_37 = arith.constant 0 : index
    %116 = vector.load %arg2[%c0_36, %c0_37] : memref<8x36xf32, #tpu.memory_space<vmem>>, vector<8x36xf32>
    %cst_38 = arith.constant dense<0.000000e+00> : vector<8x512xf32>
    %117 = tpu.matmul %116, %115, %cst_38 {dimension_numbers = #tpu.dot_dimension_numbers<[1], [0], [0], [1], [0, 0, 1, 1], [], []>} : vector<8x36xf32>, vector<36x512xf32>, vector<8x512xf32> -> vector<8x512xf32>
    %118 = vector.extract_strided_slice %117 {offsets = [0, 0], sizes = [8, 256], strides = [1, 1]} : vector<8x512xf32> to vector<8x256xf32>
    %c0_39 = arith.constant 0 : index
    %c0_40 = arith.constant 0 : index
    %c0_41 = arith.constant 0 : index
    %119 = vector.load %arg3[%c0_39, %c0_40, %c0_41] : memref<2x8x256xf32, #tpu.memory_space<vmem>>, vector<1x8x256xf32>
    %120 = vector.shape_cast %119 : vector<1x8x256xf32> to vector<8x256xf32>
    %121 = vector.shape_cast %118 : vector<8x256xf32> to vector<1x8x256xf32>
    tpu.vector_store %arg3[%c0_39, %c0_40, %c0_41], %121 {strides = array<i32>} : memref<2x8x256xf32, #tpu.memory_space<vmem>>, vector<1x8x256xf32>,
    %122 = vector.extract_strided_slice %117 {offsets = [0, 256], sizes = [8, 256], strides = [1, 1]} : vector<8x512xf32> to vector<8x256xf32>
    %c1_42 = arith.constant 1 : index
    %c0_43 = arith.constant 0 : index
    %c0_44 = arith.constant 0 : index
    %123 = vector.load %arg3[%c1_42, %c0_43, %c0_44] : memref<2x8x256xf32, #tpu.memory_space<vmem>>, vector<1x8x256xf32>
    %124 = vector.shape_cast %123 : vector<1x8x256xf32> to vector<8x256xf32>
    %125 = vector.shape_cast %122 : vector<8x256xf32> to vector<1x8x256xf32>
    tpu.vector_store %arg3[%c1_42, %c0_43, %c0_44], %125 {strides = array<i32>} : memref<2x8x256xf32, #tpu.memory_space<vmem>>, vector<1x8x256xf32>,
    return
  }
  func.func @transform_0(%arg0: i32) -> (i32, i32, i32) {
    %c0_i32 = arith.constant 0 : i32
    %c0_i32_0 = arith.constant 0 : i32
    %c0_i32_1 = arith.constant 0 : i32
    return %arg0, %c0_i32, %c0_i32_0 : i32, i32, i32
  }
  func.func @transform_1(%arg0: i32) -> (i32, i32) {
    %c0_i32 = arith.constant 0 : i32
    %c0_i32_0 = arith.constant 0 : i32
    %c0_i32_1 = arith.constant 0 : i32
    return %c0_i32, %c0_i32_0 : i32, i32
  }
  func.func @transform_2(%arg0: i32) -> (i32, i32, i32) {
    %c0_i32 = arith.constant 0 : i32
    %c0_i32_0 = arith.constant 0 : i32
    %c0_i32_1 = arith.constant 0 : i32
    return %arg0, %c0_i32, %c0_i32_0 : i32, i32, i32
  }
}

</mosaic_0001>

<bundles_post_ra>
// kernel: conv_forward.1
= control target key start
LH: loop header
LB: loop body
LE: loop exit
PB: predicated region body
PF: predicated region fallthrough
CT: control target
= control target key end

     0   :  { %s484_s13 = smov 112   ;;  %s485_s14 = smov 111   ;;  %v491_v4 = vmov 0.0   ;;  %v11_v5 = vlaneseq  ;;  %vm186_vm5 = vcmask 1043456   ;;  %s784_s0 = inlined_call_operand.vmem [shape: f32[2,4,256], index: 0, kind: input, shape index: {}]   ;;  %s785_s1 = inlined_call_operand.vmem [shape: f32[8,36], index: 1, kind: input, shape index: {}]   ;;  %s786_s2 = inlined_call_operand.vmem [shape: f32[2,8,256], index: 2, kind: output, shape index: {}]  }
   0x1   :  { %v511_v0 = vld [vmem:[%s784_s0 + $0x8] sm:$0xff]  ;;  %v516_v1 = vld [vmem:[%s784_s0] sm:$0xff]  ;;  %s486_s0 = smov 127   ;;  %s487_s15 = smov 113   ;;  %377 = vmatprep.mubr.f32.mxu0 %v491_v4  ;;  %448 = vmatprep.mubr.f32.mxu1 %v491_v4 }
   0x2   :  { %248 = vrot.lane.b32.xlu1 %v511_v0, %s484_s13  ;;  %136 = vrot.lane.b32.xlu0 %v516_v1, %s484_s13  ;;  %v522_v2 = vcombine.high %v511_v0, %v511_v0  ;;  %v526_v3 = vcombine.high %v516_v1, %v516_v1  ;;  %s488_s16 = smov 1   ;;  %s489_s17 = smov 15   ;;  %v558_v6 = vand.u32 127, %v11_v5 }
   0x3   :  { %s490_s18 = smov 16   ;;  %s492_s19 = smov 17  }
   0x4   :  { %v561_v7 = vadd.s32 128, %v558_v6  ;;  %v22_v11 = vand.u32 15, %v558_v6  ;;  %vm153_vm2 = vcmp.lt.s32.totalorder %v558_v6, 111  ;;  %vm140_vm6 = vcmp.lt.s32.totalorder %v558_v6, 112 }
   0x5   :  { %vm114_vm7 = vcmp.lt.s32.totalorder %v558_v6, 127  ;;  %vm127_vm9 = vcmp.lt.s32.totalorder %v558_v6, 113  ;;  %vm101_vm12 = vcmp.lt.s32.totalorder %v558_v6, 1  ;;  %vm14_vm13 = vcmp.ge.s32.totalorder %v558_v6, 16 }
   0x6   :  { %250 = vrot.lane.b32.xlu1 %v522_v2, %s484_s13  ;;  %138 = vrot.lane.b32.xlu0 %v526_v3, %s484_s13  ;;  %v29_v10 = vand.u32 15, %v561_v7  ;;  %vm17_vm1 = vcmp.lt.s32.totalorder %v561_v7, 240  ;;  %vm579_vm4 = vcmp.lt.s32.totalorder %v22_v11, 15  ;;  %vm624_vm10 = vcmp.ge.s32.totalorder %v22_v11, 1 }
   0x7   :  { %vm88_vm14 = vcmp.lt.s32.totalorder %v558_v6, 15  ;;  %vm697_vm15 = vmand %vm14_vm13, %vm579_vm4 }
   0x8   :  { %vm565_vm0 = vcmp.lt.s32.totalorder %v29_v10, 15  ;;  %vm607_vm8 = vcmp.ge.s32.totalorder %v29_v10, 1 }
   0x9   :  { %vm575_vm3 = vmand %vm17_vm1, %vm565_vm0 }
   0xa   :  { %151 = vrot.lane.b32.xlu1 %v526_v3, %s485_s14  ;;  %149 = vrot.lane.b32.xlu0 %v516_v1, %s485_s14  ;;  %vm632_vm11 = vmand %vm17_vm1, %vm607_vm8 }
   0xe   :  { %258 = vrot.lane.b32.xlu1 %v522_v2, %s485_s14  ;;  %256 = vrot.lane.b32.xlu0 %v511_v0, %s485_s14 }
  0x12   :  { %112 = vrot.lane.b32.xlu1 %v526_v3, %s486_s0  ;;  %110 = vrot.lane.b32.xlu0 %v516_v1, %s486_s0 }
  0x16   :  { %125 = vrot.lane.b32.xlu1 %v526_v3, %s487_s15  ;;  %123 = vrot.lane.b32.xlu0 %v516_v1, %s487_s15 }
  0x1a   :  { %234 = vrot.lane.b32.xlu1 %v522_v2, %s486_s0  ;;  %232 = vrot.lane.b32.xlu0 %v511_v0, %s486_s0 }
  0x1e   :  { %242 = vrot.lane.b32.xlu1 %v522_v2, %s487_s15  ;;  %240 = vrot.lane.b32.xlu0 %v511_v0, %s487_s15 }
  0x22   :  { %99 = vrot.lane.b32.xlu1 %v526_v3, %s488_s16  ;;  %97 = vrot.lane.b32.xlu0 %v516_v1, %s488_s16 }
  0x26   :  { %226 = vrot.lane.b32.xlu1 %v522_v2, %s488_s16  ;;  %224 = vrot.lane.b32.xlu0 %v511_v0, %s488_s16 }
  0x2a   :  { %86 = vrot.lane.b32.xlu1 %v526_v3, %s489_s17  ;;  %84 = vrot.lane.b32.xlu0 %v516_v1, %s489_s17 }
  0x2e   :  { %218 = vrot.lane.b32.xlu1 %v522_v2, %s489_s17  ;;  %216 = vrot.lane.b32.xlu0 %v511_v0, %s489_s17 }
  0x32   :  { %73 = vrot.lane.b32.xlu1 %v526_v3, %s490_s18  ;;  %71 = vrot.lane.b32.xlu0 %v516_v1, %s490_s18 }
  0x36   :  { %210 = vrot.lane.b32.xlu1 %v522_v2, %s490_s18  ;;  %208 = vrot.lane.b32.xlu0 %v511_v0, %s490_s18 }
  0x3a   :  { %60 = vrot.lane.b32.xlu1 %v526_v3, %s492_s19  ;;  %58 = vrot.lane.b32.xlu0 %v516_v1, %s492_s19 }
  0x3e   :  { %202 = vrot.lane.b32.xlu1 %v522_v2, %s492_s19  ;;  %200 = vrot.lane.b32.xlu0 %v511_v0, %s492_s19 }
  0x74   :  { %v249_v8 = vpop.permute.xlu1 %248  ;;  %v137_v9 = vpop.permute.xlu0 %136 }
  0x78   :  { %v251_v12 = vpop.permute.xlu1 %250  ;;  %v139_v13 = vpop.permute.xlu0 %138 }
  0x79   :  { %v142_v29 = vsel %vm140_vm6, %v139_v13, %v137_v9  ;;  %v141_v33 = vsel %vm140_vm6, %v137_v9, %v139_v13  ;;  %v253_v51 = vsel %vm140_vm6, %v251_v12, %v249_v8  ;;  %v252_v56 = vsel %vm140_vm6, %v249_v8, %v251_v12 }
  0x7a   :  { %v148_v36 = vsel %vm17_vm1, %v142_v29, 0.0  ;;  %v182_v41 = vrot.slane %v141_v33, 4  ;;  %v255_v60 = vsel %vm17_vm1, %v253_v51, 0.0  ;;  %v284_v4 = vrot.slane %v252_v56, 4 }
  0x7b   :  { %v183_v44 = vrot.slane %v148_v36, 4  ;;  %v285_v9 = vrot.slane %v255_v60, 4  ;;  %vm75_vm1 = vcmp.lt.s32.totalorder %v558_v6, 16 }
  0x7c   :  { %v152_v17 = vpop.permute.xlu1 %151  ;;  %v150_v18 = vpop.permute.xlu0 %149 }
  0x7d   :  { %v154_v19 = vsel %vm153_vm2, %v150_v18, %v152_v17  ;;  %v155_v20 = vsel %vm153_vm2, %v152_v17, %v150_v18 }
  0x7e   :  { %v161_v21 = vsel %vm575_vm3, %v155_v20, 0.0  ;;  %v160_v22 = vsel %vm579_vm4, %v154_v19, 0.0 }
  0x7f   :  { %465 = vmatprep.subr.msk.mxu0 %vm186_vm5, %v161_v21 }
  0x80   :  { %v259_v23 = vpop.permute.xlu1 %258  ;;  %466 = vmatpush1.msk.msra.mxu0 %vm186_vm5, %v160_v22  ;;  %v257_v24 = vpop.permute.xlu0 %256 }
  0x81   :  { %v260_v25 = vsel %vm153_vm2, %v257_v24, %v259_v23  ;;  %v261_v26 = vsel %vm153_vm2, %v259_v23, %v257_v24  ;;  %vm739_vm2 = vmand %vm14_vm13, %vm624_vm10 }
  0x82   :  { %v263_v27 = vsel %vm575_vm3, %v261_v26, 0.0  ;;  %v262_v28 = vsel %vm579_vm4, %v260_v25, 0.0  ;;  %vm297_vm3 = vcmask 293888  }
  0x83   :  { %468 = vmatprep.subr.msk.mxu1 %vm186_vm5, %v263_v27 }
  0x84   :  { %v113_v30 = vpop.permute.xlu1 %112  ;;  %469 = vmatpush1.msk.msra.mxu1 %vm186_vm5, %v262_v28  ;;  %v111_v31 = vpop.permute.xlu0 %110 }
  0x85   :  { %v115_v34 = vsel %vm114_vm7, %v111_v31, %v113_v30  ;;  %v116_v35 = vsel %vm114_vm7, %v113_v30, %v111_v31 }
  0x86   :  { %v122_v37 = vsel %vm565_vm0, %v116_v35, 0.0  ;;  %v121_v38 = vsel %vm579_vm4, %v115_v34, 0.0 }
  0x87   :  { %v177_v45 = vrot.slane %v122_v37, 4  ;;  %v176_v48 = vrot.slane %v121_v38, 4 }
  0x88   :  { %v126_v42 = vpop.permute.xlu1 %125  ;;  %v124_v43 = vpop.permute.xlu0 %123 }
  0x89   :  { %v128_v46 = vsel %vm127_vm9, %v124_v43, %v126_v42  ;;  %v129_v47 = vsel %vm127_vm9, %v126_v42, %v124_v43  ;;  %v192_v59 = vsel %vm186_vm5, %v526_v3, %v177_v45  ;;  %v191_v62 = vsel %vm186_vm5, %v516_v1, %v176_v48 }
  0x8a   :  { %v134_v49 = vsel %vm624_vm10, %v128_v46, 0.0  ;;  %v135_v50 = vsel %vm632_vm11, %v129_v47, 0.0 }
  0x8b   :  { %v194_v52 = vsel %vm186_vm5, %v135_v50, %v183_v44  ;;  %v193_v53 = vsel %vm186_vm5, %v134_v49, %v182_v41 }
  0x8c   :  { %v235_v54 = vpop.permute.xlu1 %234  ;;  %337 = vmatprep.subr.mxu0 %v194_v52  ;;  %v233_v55 = vpop.permute.xlu0 %232 }
  0x8d   :  { %v236_v57 = vsel %vm114_vm7, %v233_v55, %v235_v54  ;;  %v237_v58 = vsel %vm114_vm7, %v235_v54, %v233_v55  ;;  %338 = vmatpush1.msra.mxu0 %v193_v53 }
  0x8e   :  { %v239_v61 = vsel %vm565_vm0, %v237_v58, 0.0  ;;  %339 = vmatprep.subr.mxu0 %v192_v59  ;;  %v238_v63 = vsel %vm579_vm4, %v236_v57, 0.0 }
  0x8f   :  { %340 = vmatpush1.msra.mxu0 %v191_v62  ;;  %v279_v10 = vrot.slane %v239_v61, 4  ;;  %v278_v11 = vrot.slane %v238_v63, 4 }
  0x90   :  { %v243_v5 = vpop.permute.xlu1 %242  ;;  %v241_v8 = vpop.permute.xlu0 %240 }
  0x91   :  { %v244_v3 = vsel %vm127_vm9, %v241_v8, %v243_v5  ;;  %v245_v7 = vsel %vm127_vm9, %v243_v5, %v241_v8  ;;  %v293_v19 = vsel %vm186_vm5, %v522_v2, %v279_v10  ;;  %v292_v20 = vsel %vm186_vm5, %v511_v0, %v278_v11 }
  0x92   :  { %v246_v12 = vsel %vm624_vm10, %v244_v3, 0.0  ;;  %v247_v1 = vsel %vm632_vm11, %v245_v7, 0.0  ;;  %v296_v7 = vld [vmem:[%s785_s1] sm:$0xff] }
  0x93   :  { %v295_v13 = vsel %vm186_vm5, %v247_v1, %v285_v9  ;;  %v294_v15 = vsel %vm186_vm5, %v246_v12, %v284_v4 }
  0x94   :  { %v100_v17 = vpop.permute.xlu1 %99  ;;  %408 = vmatprep.subr.mxu1 %v295_v13  ;;  %v98_v18 = vpop.permute.xlu0 %97 }
  0x95   :  { %409 = vmatpush1.msra.mxu1 %v294_v15  ;;  %v102_v21 = vsel %vm101_vm12, %v98_v18, %v100_v17  ;;  %v103_v22 = vsel %vm101_vm12, %v100_v17, %v98_v18 }
  0x96   :  { %410 = vmatprep.subr.mxu1 %v293_v19  ;;  %v108_v25 = vsel %vm624_vm10, %v103_v22, 0.0  ;;  %v109_v2 = vsel %vm607_vm8, %v102_v21, 0.0 }
  0x97   :  { %411 = vmatpush1.msra.mxu1 %v292_v20  ;;  %v170_v30 = vrot.slane %v108_v25, 4  ;;  %v171_v31 = vrot.slane %v109_v2, 4 }
  0x98   :  { %v227_v23 = vpop.permute.xlu1 %226  ;;  %v225_v24 = vpop.permute.xlu0 %224 }
  0x99   :  { %v228_v0 = vsel %vm101_vm12, %v225_v24, %v227_v23  ;;  %v229_v26 = vsel %vm101_vm12, %v227_v23, %v225_v24 }
  0x9a   :  { %v230_v35 = vsel %vm624_vm10, %v229_v26, 0.0  ;;  %v231_v16 = vsel %vm607_vm8, %v228_v0, 0.0 }
  0x9b   :  { %v272_v43 = vrot.slane %v230_v35, 4  ;;  %v273_v44 = vrot.slane %v231_v16, 4 }
  0x9c   :  { %v87_v28 = vpop.permute.xlu1 %86  ;;  %v85_v29 = vpop.permute.xlu0 %84 }
  0x9d   :  { %v89_v33 = vsel %vm88_vm14, %v85_v29, %v87_v28  ;;  %v90_v34 = vsel %vm88_vm14, %v87_v28, %v85_v29 }
  0x9e   :  { %v95_v36 = vsel %vm697_vm15, %v90_v34, 0.0  ;;  %v96_v37 = vsel %vm565_vm0, %v89_v33, 0.0 }
  0x9f   :  { %v190_v38 = vsel %vm186_vm5, %v96_v37, %v171_v31  ;;  %v189_v40 = vsel %vm186_vm5, %v95_v36, %v170_v30 }
  0xa0   :  { %v219_v41 = vpop.permute.xlu1 %218  ;;  %341 = vmatprep.subr.mxu0 %v190_v38  ;;  %v217_v42 = vpop.permute.xlu0 %216 }
  0xa1   :  { %v220_v45 = vsel %vm88_vm14, %v217_v42, %v219_v41  ;;  %v221_v46 = vsel %vm88_vm14, %v219_v41, %v217_v42  ;;  %342 = vmatpush1.msra.mxu0 %v189_v40 }
  0xa2   :  { %v222_v47 = vsel %vm697_vm15, %v221_v46, 0.0  ;;  %v223_v48 = vsel %vm565_vm0, %v220_v45, 0.0  ;;  %vm62_vm0 = vcmp.lt.s32.totalorder %v558_v6, 17 }
  0xa3   :  { %v291_v49 = vsel %vm186_vm5, %v223_v48, %v273_v44  ;;  %v290_v50 = vsel %vm186_vm5, %v222_v47, %v272_v43 }
  0xa4   :  { %v74_v51 = vpop.permute.xlu1 %73  ;;  %412 = vmatprep.subr.mxu1 %v291_v49  ;;  %v72_v52 = vpop.permute.xlu0 %71 }
  0xa5   :  { %413 = vmatpush1.msra.mxu1 %v290_v50  ;;  %v77_v53 = vsel %vm75_vm1, %v74_v51, %v72_v52  ;;  %v76_v56 = vsel %vm75_vm1, %v72_v52, %v74_v51 }
  0xa6   :  { %v82_v14 = vsel %vm14_vm13, %v77_v53, 0.0  ;;  %v165_v62 = vrot.slane %v76_v56, 4 }
  0xa7   :  { %v164_v61 = vrot.slane %v82_v14, 4 }
  0xa8   :  { %v211_v54 = vpop.permute.xlu1 %210  ;;  %v209_v55 = vpop.permute.xlu0 %208 }
  0xa9   :  { %v213_v57 = vsel %vm75_vm1, %v211_v54, %v209_v55  ;;  %v212_v5 = vsel %vm75_vm1, %v209_v55, %v211_v54 }
  0xaa   :  { %v214_v39 = vsel %vm14_vm13, %v213_v57, 0.0  ;;  %v267_v13 = vrot.slane %v212_v5, 4 }
  0xab   :  { %v266_v1 = vrot.slane %v214_v39, 4 }
  0xac   :  { %v61_v59 = vpop.permute.xlu1 %60  ;;  %v59_v60 = vpop.permute.xlu0 %58 }
  0xad   :  { %v63_v63 = vsel %vm62_vm0, %v59_v60, %v61_v59  ;;  %v64_v4 = vsel %vm62_vm0, %v61_v59, %v59_v60 }
  0xae   :  { %v69_v8 = vsel %vm739_vm2, %v64_v4, 0.0  ;;  %v70_v9 = vsel %vm607_vm8, %v63_v63, 0.0 }
  0xaf   :  { %v188_v10 = vsel %vm186_vm5, %v70_v9, %v165_v62  ;;  %v187_v3 = vsel %vm186_vm5, %v69_v8, %v164_v61 }
  0xb0   :  { %v203_v11 = vpop.permute.xlu1 %202  ;;  %343 = vmatprep.subr.mxu0 %v188_v10  ;;  %v201_v12 = vpop.permute.xlu0 %200 }
  0xb1   :  { %v204_v15 = vsel %vm62_vm0, %v201_v12, %v203_v11  ;;  %v205_v17 = vsel %vm62_vm0, %v203_v11, %v201_v12  ;;  %344 = vmatpush1.msra.mxu0 %v187_v3 }
  0xb2   :  { %v206_v18 = vsel %vm739_vm2, %v205_v17, 0.0  ;;  %v207_v19 = vsel %vm607_vm8, %v204_v15, 0.0  ;;  %467 = vmatmul.mubr.msk.f32.vlgmr.msra.gmra.mxu0 %vm297_vm3, %v296_v7 }
  0xb3   :  { %v289_v20 = vsel %vm186_vm5, %v207_v19, %v267_v13  ;;  %v288_v21 = vsel %vm186_vm5, %v206_v18, %v266_v1 }
  0xb4   :  { %414 = vmatprep.subr.mxu1 %v289_v20 }
  0xb5   :  { %415 = vmatpush1.msra.mxu1 %v288_v21 }
  0xb6   :  { %470 = vmatmul.mubr.msk.f32.vlgmr.msra.gmra.mxu1 %vm297_vm3, %v296_v7 }
 0x172   :  { %v379_v22 = vpop.f32.mrf.mxu0 }
 0x173   :  { %455 = vst [vmem:[%s786_s2] sm:$0xff] %v379_v22 }
 0x174   :  { %v381_v6 = vpop.f32.mrf.mxu0 }
 0x175   :  { %456 = vst [vmem:[%s786_s2 + $0x8] sm:$0xff] %v381_v6 }
 0x176   :  { %v450_v32 = vpop.f32.mrf.mxu1 }
 0x177   :  { %471 = vst [vmem:[%s786_s2 + $0x10] sm:$0xff] %v450_v32 }
 0x178   :  { %v452_v23 = vpop.f32.mrf.mxu1 }
 0x179   :  { %472 = vst [vmem:[%s786_s2 + $0x18] sm:$0xff] %v452_v23 }

</bundles_post_ra>
